<compile_context>
chip_gen: v7x
topology: tpu7x:2x2x1
jax: 0.10.0
libtpu: 0.0.40
codegen_flags: <defaults>
</compile_context>

<pallas_src>
import functools

import jax
import jax.numpy as jnp
from jax.experimental import pallas as pl
from jax.experimental.pallas import tpu as pltpu

IN_FEATURES = 5
GROUP = 128                       # batch rows packed per lane-dense tile row
ROW_LANES = GROUP * IN_FEATURES   # 640 lanes per tile row (5 x 128, lane-dense)


def fused_linear_sigmoid_kernel(x_ref, s_ref, b_ref, o_ref):
    """o = sigmoid(x_packed @ S + b), 128 batch rows per tile row.

    x_ref: (tr, 640)  VMEM -- native (B,5) buffer viewed as (B/128, 640);
                              5 features of 128 batch rows interleaved per row
    s_ref: (640, 128) VMEM -- selection-weight matrix, S[5*j + k, j] = wf[k]
    b_ref: (1,)       SMEM -- fused bias  b1 @ W2^T + b2
    o_ref: (tr, 128)  VMEM -- sigmoid(x @ (W1^T W2^T) + bias), batch on lanes
    """
    y = jnp.dot(x_ref[...], s_ref[...], preferred_element_type=jnp.float32)
    o_ref[...] = jax.nn.sigmoid(y + b_ref[0])


@functools.partial(jax.jit, static_argnames=("max_rows_per_step",))
def nn_forward(x, w1, b1, w2, b2, *, max_rows_per_step=4096):
    """Forward pass of NN.  x: (B,5) f32; torch layouts: w1 (5,5)=(out,in), b1 (5,),
    w2 (1,5), b2 (1,).  Returns (B,1) f32, matching the torch module."""
    x = jnp.asarray(x, jnp.float32)
    w1 = jnp.asarray(w1, jnp.float32)
    b1 = jnp.asarray(b1, jnp.float32)
    w2 = jnp.asarray(w2, jnp.float32)
    b2 = jnp.asarray(b2, jnp.float32)
    B = x.shape[0]

    # ---- Fold the two affine layers (valid: no activation between them) -----
    # (x @ W1^T + b1) @ W2^T + b2 == x @ (W1^T W2^T) + (b1 W2^T + b2)
    wf = (w1.T @ w2.T).reshape(IN_FEATURES)   # (5,)
    bf = (b1 @ w2.T + b2).reshape(1)          # (1,) -> SMEM scalar

    # ---- Constant selection-weight matrix (loaded into VMEM once) -----------
    # S[5*j + k, j] = wf[k]: one MXU matmul of a (tr, 640) tile against S does the
    # 5-feature contraction for 128 batch rows per tile row, with every vreg fully
    # lane-occupied.  It performs 128x the strictly necessary MACs, but the op is
    # HBM-bound, so the MXU time hides under the per-step DMA on v6e/v7x
    # (lane-sparse VPU/XLU alternatives are ~10x slower).
    m = jnp.arange(ROW_LANES)
    sel = (m[:, None] // IN_FEATURES) == jnp.arange(GROUP)[None, :]
    s_mat = jnp.where(sel, wf[m % IN_FEATURES][:, None], jnp.float32(0.0))  # (640,128)

    # ---- View x lane-densely WITHOUT a relayout ------------------------------
    # (B,5) row-major -> (B/128, 640) is a contiguous reshape (bitcast; no extra
    # HBM pass).  Only a batch that is not a multiple of 128 pays for a pad copy.
    if B % GROUP != 0:
        # TODO(synk): the ragged tail could be handled by a second tiny call
        # instead of padding (the pad re-copies x); typical batches are 128-aligned.
        x = jnp.pad(x, ((0, GROUP - B % GROUP), (0, 0)))
    G = x.shape[0] // GROUP
    xg = x.reshape(G, ROW_LANES)

    # ---- Tile rows per grid step ----------------------------------------------
    # Big tiles amortize the ~0.35 us fixed per-grid-step cost (tr=4096 moves
    # ~10 MiB of input + ~2 MiB of output per step), while keeping >= 2 grid steps
    # whenever possible so the "parallel" batch axis shards across v7x's two
    # TensorCores.  Double-buffered footprint at tr=4096 is ~25 MiB: fits v7x's
    # 64 MiB physical VMEM and the 32 MiB scoped limit requested below.
    if G <= 8:
        tr = G                                        # single (possibly ragged) tile
    else:
        tr = min(max_rows_per_step, (G + 1) // 2)     # >= 2 grid steps
        tr = ((tr + 7) // 8) * 8                      # sublane-aligned
    grid = ((G + tr - 1) // tr,)                      # ragged last tile: OOB reads are
                                                      # garbage, OOB writes are masked

    out = pl.pallas_call(
        fused_linear_sigmoid_kernel,
        out_shape=jax.ShapeDtypeStruct((G, GROUP), jnp.float32),
        grid=grid,
        in_specs=[
            pl.BlockSpec((tr, ROW_LANES), lambda i: (i, 0)),     # x tile (VMEM)
            pl.BlockSpec((ROW_LANES, GROUP), lambda i: (0, 0)),  # S: constant block
            pl.BlockSpec(memory_space=pltpu.MemorySpace.SMEM),   # fused bias (1,)
        ],
        out_specs=pl.BlockSpec((tr, GROUP), lambda i: (i, 0)),   # lane-dense output
        compiler_params=pltpu.CompilerParams(
            dimension_semantics=("parallel",),
            vmem_limit_bytes=32 * 1024 * 1024,
        ),
    )(xg, s_mat, bf)

    # (G,128) -> (B,1): contiguous reshape, then slice off the padded tail rows.
    return out.reshape(G * GROUP)[:B].reshape(B, 1)


if __name__ == "__main__":
    key = jax.random.PRNGKey(0)
    kx, k1, k2, k3, k4, kx2 = jax.random.split(key, 6)

    # Deterministic params in torch nn.Linear layout: weight (out,in), bias (out,)
    bound = 1.0 / jnp.sqrt(5.0)
    w1 = jax.random.uniform(k1, (5, 5), jnp.float32, -bound, bound)
    b1 = jax.random.uniform(k2, (5,), jnp.float32, -bound, bound)
    w2 = jax.random.uniform(k3, (1, 5), jnp.float32, -bound, bound)
    b2 = jax.random.uniform(k4, (1,), jnp.float32, -bound, bound)

    def reference(xv):
        return jax.nn.sigmoid((xv @ w1.T + b1) @ w2.T + b2)

    # Batch multiple of 128: zero-copy reshape path, 2 grid steps on the parallel axis.
    x = jax.random.normal(kx, (4096, IN_FEATURES), dtype=jnp.float32)
    out = jax.block_until_ready(nn_forward(x, w1, b1, w2, b2))
    assert out.shape == (4096, 1)
    assert jnp.allclose(out, reference(x), atol=1e-5, rtol=1e-5)

    # Ragged batch (not a multiple of 128): exercises the padded path + ragged last tile.
    x2 = jax.random.normal(kx2, (1100, IN_FEATURES), dtype=jnp.float32)
    out2 = jax.block_until_ready(nn_forward(x2, w1, b1, w2, b2))
    assert out2.shape == (1100, 1)
    assert jnp.allclose(out2, reference(x2), atol=1e-5, rtol=1e-5)

    print("KERNEL_OK")
</pallas_src>

<mosaic_0001>
module attributes {stable_mosaic.version = 11 : i64} {
  func.func @fused_linear_sigmoid_kernel(%arg0: i32, %arg1: memref<16x640xf32, #tpu.memory_space<vmem>>, %arg2: memref<640x128xf32, #tpu.memory_space<vmem>>, %arg3: memref<1xf32, #tpu.memory_space<smem>>, %arg4: memref<16x128xf32, #tpu.memory_space<vmem>>) attributes {dimension_semantics = [#tpu.dimension_semantics<parallel>], iteration_bounds = array<i64: 2>, scalar_prefetch = 0 : i64, scratch_operands = 0 : i64, tpu.core_type = #tpu.core_type<tc>, window_params = [{transform_indices = @transform_0, window_bounds = array<i64: 16, 640>}, {pipeline_mode = #tpu.pipeline_mode<synchronous>, transform_indices = @transform_1, window_bounds = array<i64: 640, 128>}, {transform_indices = @transform_2, window_bounds = array<i64: 1>}, {transform_indices = @transform_3, window_bounds = array<i64: 16, 128>}]} {
    %c0 = arith.constant 0 : index
    %c0_0 = arith.constant 0 : index
    %0 = vector.load %arg1[%c0, %c0_0] : memref<16x640xf32, #tpu.memory_space<vmem>>, vector<16x640xf32>
    %c0_1 = arith.constant 0 : index
    %c0_2 = arith.constant 0 : index
    %1 = vector.load %arg2[%c0_1, %c0_2] : memref<640x128xf32, #tpu.memory_space<vmem>>, vector<640x128xf32>
    %cst = arith.constant dense<0.000000e+00> : vector<16x128xf32>
    %2 = tpu.matmul %0, %1, %cst {dimension_numbers = #tpu.dot_dimension_numbers<[1], [0], [0], [1], [0, 0, 1, 1], [], []>} : vector<16x640xf32>, vector<640x128xf32>, vector<16x128xf32> -> vector<16x128xf32>
    %c0_3 = arith.constant 0 : index
    %3 = memref.load %arg3[%c0_3] : memref<1xf32, #tpu.memory_space<smem>>
    %4 = vector.broadcast %3 : f32 to vector<16x128xf32>
    %5 = arith.addf %2, %4 : vector<16x128xf32>
    %6 = arith.negf %5 : vector<16x128xf32>
    %7 = math.exp %6 : vector<16x128xf32>
    %cst_4 = arith.constant 1.000000e+00 : f32
    %8 = vector.broadcast %cst_4 : f32 to vector<16x128xf32>
    %9 = arith.addf %8, %7 : vector<16x128xf32>
    %10 = arith.divf %8, %9 : vector<16x128xf32>
    %c0_5 = arith.constant 0 : index
    %c0_6 = arith.constant 0 : index
    %11 = vector.load %arg4[%c0_5, %c0_6] : memref<16x128xf32, #tpu.memory_space<vmem>>, vector<16x128xf32>
    tpu.vector_store %arg4[%c0_5, %c0_6], %10 {strides = array<i32>} : memref<16x128xf32, #tpu.memory_space<vmem>>, vector<16x128xf32>,
    return
  }
  func.func @transform_0(%arg0: i32) -> (i32, i32) {
    %c0_i32 = arith.constant 0 : i32
    %c0_i32_0 = arith.constant 0 : i32
    return %arg0, %c0_i32 : i32, i32
  }
  func.func @transform_1(%arg0: i32) -> (i32, i32) {
    %c0_i32 = arith.constant 0 : i32
    %c0_i32_0 = arith.constant 0 : i32
    %c0_i32_1 = arith.constant 0 : i32
    return %c0_i32, %c0_i32_0 : i32, i32
  }
  func.func @transform_2(%arg0: i32) -> i32 {
    %c0_i32 = arith.constant 0 : i32
    %c0_i32_0 = arith.constant 0 : i32
    return %c0_i32 : i32
  }
  func.func @transform_3(%arg0: i32) -> (i32, i32) {
    %c0_i32 = arith.constant 0 : i32
    %c0_i32_0 = arith.constant 0 : i32
    return %arg0, %c0_i32 : i32, i32
  }
}

</mosaic_0001>

<bundles_post_ra>
// kernel: nn_forward.1
= control target key start
LH: loop header
LB: loop body
LE: loop exit
PB: predicated region body
PF: predicated region fallthrough
CT: control target
= control target key end

     0   :  { %s1330_s0 = inlined_call_operand.vmem [shape: f32[32,640], index: 0, kind: input, shape index: {}]   ;;  %s1331_s1 = inlined_call_operand.vmem [shape: f32[640,128], index: 1, kind: input, shape index: {}]   ;;  %s1332_s2 = inlined_call_operand.<no memory space> [shape: f32[1], index: 2, kind: input, shape index: {}]   ;;  %s1333_s3 = inlined_call_operand.hbm [shape: f32[32,128], index: 3, kind: output, shape index: {}]  }
   0x1   :  { %8 = sst [smem:[#allocation2]] %s1332_s2 }
   0x2   :  { %9 = vsyncpa [#allocation4], 0 }
   0x3   :  { %11 = vsyncpa [#allocation4 + $0x1], 0  ;;  %s963_s14 = smov 0   ;;  %s965_s15 = smov 0  }
   0x4   :  { %s967_s16 = smov 0   ;;  %s969_s17 = smov 0  }
   0x5 LB: > { %s984_s2 = sadd.s32 4294967295, %s935_s17   ;;  %s583_s18 = sadd.s32 4294967294, %s935_s17   ;;  %s935_s17 = sphi %s969_s17, %s1340_s17   ;;  %s931_s16 = sphi %s967_s16, %s1339_s16   ;;  %s927_s15 = sphi %s965_s15, %s1338_s15   ;;  %s923_s14 = sphi %s963_s14, %s1337_s14  }
   0x6   : > { %s988_s19 = sadd.s32 1, %s935_s17   ;;  %s92_s20 = sadd.s32 1, %s931_s16 }
   0x7   : > { %s89_s21 = ssub.s32 %s935_s17, %s988_s19  ;;  %p102_p0 = scmp.ne.s32.totalorder %s931_s16, %s927_s15 }
   0x8   : > { %p90_p1 = scmp.eq.s32.totalorder %s89_s21, 0  ;;  %p103_p2 = scmp.eq.s32.totalorder %s984_s2, 1 }
   0x9   : > { %p108_p3 = scmp.ne.s32.totalorder %s927_s15, %s923_s14  ;;  %p109_p4 = scmp.eq.s32.totalorder %s583_s18, 1 }
   0xa   : > { %s999_s22 = scalar_select %p90_p1, %s931_s16, %s92_s20  }
   0xb   : > { %p1001_p5 = por %p103_p2, %p102_p0  ;;  %p1005_p6 = por %p109_p4, %p108_p3 }
   0xc   : > { %p586_p7 = scmp.ge.s32.totalorder %s935_s17, 1  ;;  %p143_p8 = scmp.lt.s32.totalorder %s935_s17, 3 }
   0xe   : > { %p144_p9 = pnand %p586_p7, %p143_p8 }
   0xf   : > { %v202_v0 = vld [vmem:[%s1331_s1 + $0x80] sm:$0xff] (!%p144_p9)  ;;  %v203_v1 = vld [vmem:[%s1331_s1 + $0x88] sm:$0xff] (!%p144_p9)  ;;  %v204_v11 = vld [vmem:[%s1331_s1 + $0x90] sm:$0xff] (!%p144_p9)  ;;  %s588_s21 = sshll.u32 (!%p144_p9), %s984_s2, 1  ;;  %s266_s27 = sld [smem:[#allocation2]] (!%p144_p9) }
  0x10   : > { %147 = sbr.rel (%p144_p9) target bundleno = 338 (0x152), region = 32  ;;  %v186_v2 = vld [vmem:[%s1331_s1] sm:$0xff] (!%p144_p9)  ;;  %v727_v3 = vpack.c.bf16 (!%p144_p9), %v203_v1, %v202_v0  ;;  %v187_v4 = vld [vmem:[%s1331_s1 + $0x8] sm:$0xff] (!%p144_p9)  ;;  %v205_v13 = vld [vmem:[%s1331_s1 + $0x98] sm:$0xff] (!%p144_p9)  ;;  %p1068_p10 = scmp.lt.s32.totalorder (!%p144_p9), %s588_s21, 3 }
  0x11   : > { %v234_v5 = vld [vmem:[%s1331_s1 + $0x180] sm:$0xff] (!%p144_p9)  ;;  %v235_v6 = vld [vmem:[%s1331_s1 + $0x188] sm:$0xff] (!%p144_p9)  ;;  %v729_v7 = vpack.c.bf16 (!%p144_p9), %v187_v4, %v186_v2  ;;  %v188_v14 = vld [vmem:[%s1331_s1 + $0x10] sm:$0xff] (!%p144_p9)  ;;  %v731_v16 = vpack.c.bf16 (!%p144_p9), %v205_v13, %v204_v11  ;;  %s597_s29 = sshll.u32 (!%p144_p9), %s984_s2, 8  ;;  %s937_s2 = smov (!%p144_p9), [#allocation3]  }
  0x12   : > { %v759_v8 = vpack.c.bf16 (!%p144_p9), %v235_v6, %v234_v5  ;;  %v218_v9 = vld [vmem:[%s1331_s1 + $0x100] sm:$0xff] (!%p144_p9)  ;;  %v219_v10 = vld [vmem:[%s1331_s1 + $0x108] sm:$0xff] (!%p144_p9)  ;;  %728 = vmatprep.subr.bf16.mxu0 (!%p144_p9), %v727_v3  ;;  %v189_v15 = vld [vmem:[%s1331_s1 + $0x18] sm:$0xff] (!%p144_p9)  ;;  %s1285_s9 = scalar_lea.hbm (!%p144_p9), %s1333_s3, %s597_s29  ;;  %s877_s12 = sshll.u32 (!%p144_p9), %s937_s2, 4  ;;  %s878_s12 = int_to_ptr.vmem [resolvable:$false] %s877_s12 }
  0x13   : > { %v761_v12 = vpack.c.bf16 (!%p144_p9), %v219_v10, %v218_v9  ;;  %730 = vmatpush3.bf16.msra.mxu0 (!%p144_p9), %v729_v7  ;;  %v733_v17 = vpack.c.bf16 (!%p144_p9), %v189_v15, %v188_v14  ;;  %v236_v18 = vld [vmem:[%s1331_s1 + $0x190] sm:$0xff] (!%p144_p9)  ;;  %v237_v19 = vld [vmem:[%s1331_s1 + $0x198] sm:$0xff] (!%p144_p9)  ;;  %v206_v23 = vld [vmem:[%s1331_s1 + $0xa0] sm:$0xff] (!%p144_p9)  ;;  %s879_s13 = scalar_lea.vmem (!%p144_p9), %s878_s12, 512 }
  0x14   : > { %760 = vmatprep.subr.bf16.mxu1 (!%p144_p9), %v759_v8  ;;  %v220_v20 = vld [vmem:[%s1331_s1 + $0x110] sm:$0xff] (!%p144_p9)  ;;  %v763_v21 = vpack.c.bf16 (!%p144_p9), %v237_v19, %v236_v18  ;;  %v221_v22 = vld [vmem:[%s1331_s1 + $0x118] sm:$0xff] (!%p144_p9)  ;;  %v207_v24 = vld [vmem:[%s1331_s1 + $0xa8] sm:$0xff] (!%p144_p9)  ;;  %732 = vmatprep.subr.bf16.mxu0 (!%p144_p9), %v731_v16 }
  0x15   : > { %762 = vmatpush3.bf16.msra.mxu1 (!%p144_p9), %v761_v12  ;;  %v765_v25 = vpack.c.bf16 (!%p144_p9), %v221_v22, %v220_v20  ;;  %v735_v26 = vpack.c.bf16 (!%p144_p9), %v207_v24, %v206_v23  ;;  %v190_v27 = vld [vmem:[%s1331_s1 + $0x20] sm:$0xff] (!%p144_p9)  ;;  %v191_v28 = vld [vmem:[%s1331_s1 + $0x28] sm:$0xff] (!%p144_p9)  ;;  %v208_v35 = vld [vmem:[%s1331_s1 + $0xb0] sm:$0xff] (!%p144_p9) }
  0x16   : > { %v238_v29 = vld [vmem:[%s1331_s1 + $0x1a0] sm:$0xff] (!%p144_p9)  ;;  %764 = vmatprep.subr.bf16.mxu1 (!%p144_p9), %v763_v21  ;;  %v239_v30 = vld [vmem:[%s1331_s1 + $0x1a8] sm:$0xff] (!%p144_p9)  ;;  %v737_v33 = vpack.c.bf16 (!%p144_p9), %v191_v28, %v190_v27  ;;  %v209_v36 = vld [vmem:[%s1331_s1 + $0xb8] sm:$0xff] (!%p144_p9) }
  0x17   : > { %v222_v31 = vld [vmem:[%s1331_s1 + $0x120] sm:$0xff]  ;;  %v223_v32 = vld [vmem:[%s1331_s1 + $0x128] sm:$0xff]  ;;  %734 = vmatpush3.bf16.msra.mxu0 %v733_v17  ;;  %v767_v34 = vpack.c.bf16 %v239_v30, %v238_v29  ;;  %v192_v37 = vld [vmem:[%s1331_s1 + $0x30] sm:$0xff]  ;;  %v739_v39 = vpack.c.bf16 %v209_v36, %v208_v35  ;;  %s1342_s21 = smov (!%p1068_p10, %s588_s21), 3 }
  0x18   : > { %736 = vmatprep.subr.bf16.mxu0 %v735_v26  ;;  %v769_v38 = vpack.c.bf16 %v223_v32, %v222_v31  ;;  %v193_v40 = vld [vmem:[%s1331_s1 + $0x38] sm:$0xff]  ;;  %v240_v41 = vld [vmem:[%s1331_s1 + $0x1b0] sm:$0xff]  ;;  %v210_v46 = vld [vmem:[%s1331_s1 + $0xc0] sm:$0xff]  ;;  %s823_s6 = smul.u32 40, %s1342_s21 }
  0x19   : > { %766 = vmatpush3.bf16.msra.mxu1 %v765_v25  ;;  %v241_v42 = vld [vmem:[%s1331_s1 + $0x1b8] sm:$0xff]  ;;  %v224_v44 = vld [vmem:[%s1331_s1 + $0x130] sm:$0xff]  ;;  %v211_v47 = vld [vmem:[%s1331_s1 + $0xc8] sm:$0xff]  ;;  %v741_v48 = vpack.c.bf16 %v193_v40, %v192_v37 }
  0x1a   : > { %768 = vmatprep.subr.bf16.mxu1 %v767_v34  ;;  %v771_v43 = vpack.c.bf16 %v241_v42, %v240_v41  ;;  %v225_v45 = vld [vmem:[%s1331_s1 + $0x138] sm:$0xff]  ;;  %v242_v49 = vld [vmem:[%s1331_s1 + $0x1c0] sm:$0xff]  ;;  %v243_v50 = vld [vmem:[%s1331_s1 + $0x1c8] sm:$0xff]  ;;  %v743_v52 = vpack.c.bf16 %v211_v47, %v210_v46  ;;  %s1169_s7 = scalar_lea.vmem %s1330_s0, %s823_s6 }
  0x1b   : > { %738 = vmatpush3.bf16.msra.mxu0 %v737_v33  ;;  %v773_v51 = vpack.c.bf16 %v225_v45, %v224_v44  ;;  %v194_v53 = vld [vmem:[%s1331_s1 + $0x40] sm:$0xff]  ;;  %v195_v54 = vld [vmem:[%s1331_s1 + $0x48] sm:$0xff]  ;;  %v775_v56 = vpack.c.bf16 %v243_v50, %v242_v49  ;;  %v212_v58 = vld [vmem:[%s1331_s1 + $0xd0] sm:$0xff] }
  0x1c   : > { %740 = vmatprep.subr.bf16.mxu0 %v739_v39  ;;  %v226_v55 = vld [vmem:[%s1331_s1 + $0x140] sm:$0xff]  ;;  %v227_v57 = vld [vmem:[%s1331_s1 + $0x148] sm:$0xff]  ;;  %v213_v59 = vld [vmem:[%s1331_s1 + $0xd8] sm:$0xff]  ;;  %v745_v62 = vpack.c.bf16 %v195_v54, %v194_v53 }
  0x1d   : > { %770 = vmatpush3.bf16.msra.mxu1 %v769_v38  ;;  %v244_v60 = vld [vmem:[%s1331_s1 + $0x1d0] sm:$0xff]  ;;  %v245_v61 = vld [vmem:[%s1331_s1 + $0x1d8] sm:$0xff]  ;;  %v777_v63 = vpack.c.bf16 %v227_v57, %v226_v55  ;;  %v747_v0 = vpack.c.bf16 %v213_v59, %v212_v58  ;;  %v214_v6 = vld [vmem:[%s1331_s1 + $0xe0] sm:$0xff] }
  0x1e   : > { %772 = vmatprep.subr.bf16.mxu1 %v771_v43  ;;  %v196_v1 = vld [vmem:[%s1331_s1 + $0x50] sm:$0xff]  ;;  %v197_v2 = vld [vmem:[%s1331_s1 + $0x58] sm:$0xff]  ;;  %v779_v4 = vpack.c.bf16 %v245_v61, %v244_v60  ;;  %v215_v7 = vld [vmem:[%s1331_s1 + $0xe8] sm:$0xff] }
  0x1f   : > { %742 = vmatpush3.bf16.msra.mxu0 %v741_v48  ;;  %v228_v3 = vld [vmem:[%s1331_s1 + $0x150] sm:$0xff]  ;;  %v229_v5 = vld [vmem:[%s1331_s1 + $0x158] sm:$0xff]  ;;  %v246_v8 = vld [vmem:[%s1331_s1 + $0x1e0] sm:$0xff]  ;;  %v749_v10 = vpack.c.bf16 %v197_v2, %v196_v1  ;;  %v751_v14 = vpack.c.bf16 %v215_v7, %v214_v6 }
  0x20   : > { %744 = vmatprep.subr.bf16.mxu0 %v743_v52  ;;  %v247_v9 = vld [vmem:[%s1331_s1 + $0x1e8] sm:$0xff]  ;;  %v198_v11 = vld [vmem:[%s1331_s1 + $0x60] sm:$0xff]  ;;  %v781_v13 = vpack.c.bf16 %v229_v5, %v228_v3  ;;  %v216_v19 = vld [vmem:[%s1331_s1 + $0xf0] sm:$0xff]  ;;  %v267_v3 = vstv %s266_s27 }
  0x21   : > { %774 = vmatpush3.bf16.msra.mxu1 %v773_v51  ;;  %v177_v12 = vld [vmem:[%s1169_s7 + $0x8] sm:$0xff]  ;;  %v230_v16 = vld [vmem:[%s1331_s1 + $0x160] sm:$0xff]  ;;  %v783_v18 = vpack.c.bf16 %v247_v9, %v246_v8  ;;  %v217_v20 = vld [vmem:[%s1331_s1 + $0xf8] sm:$0xff] }
  0x22   : > { %776 = vmatprep.subr.bf16.mxu1 %v775_v56  ;;  %v199_v15 = vld [vmem:[%s1331_s1 + $0x68] sm:$0xff]  ;;  %332 = vmatprep.mubr.f32.mxu0 %v177_v12  ;;  %v179_v21 = vld [vmem:[%s1169_s7 + $0x18] sm:$0xff]  ;;  %v248_v22 = vld [vmem:[%s1331_s1 + $0x1f0] sm:$0xff]  ;;  %v755_v26 = vpack.c.bf16 %v217_v20, %v216_v19 }
  0x23   : > { %746 = vmatpush3.bf16.msra.mxu0 %v745_v62  ;;  %v231_v17 = vld [vmem:[%s1331_s1 + $0x168] sm:$0xff]  ;;  %v249_v23 = vld [vmem:[%s1331_s1 + $0x1f8] sm:$0xff]  ;;  %407 = vmatprep.mubr.f32.mxu1 %v179_v21  ;;  %v753_v24 = vpack.c.bf16 %v199_v15, %v198_v11  ;;  %v200_v27 = vld [vmem:[%s1331_s1 + $0x70] sm:$0xff] }
  0x24   : > { %748 = vmatprep.subr.bf16.mxu0 %v747_v0  ;;  %v785_v25 = vpack.c.bf16 %v231_v17, %v230_v16  ;;  %v201_v28 = vld [vmem:[%s1331_s1 + $0x78] sm:$0xff]  ;;  %v232_v29 = vld [vmem:[%s1331_s1 + $0x170] sm:$0xff]  ;;  %v787_v30 = vpack.c.bf16 %v249_v23, %v248_v22  ;;  %v250_v32 = vld [vmem:[%s1331_s1 + $0x200] sm:$0xff] }
  0x25   : > { %778 = vmatpush3.bf16.msra.mxu1 %v777_v63  ;;  %v233_v31 = vld [vmem:[%s1331_s1 + $0x178] sm:$0xff]  ;;  %v251_v33 = vld [vmem:[%s1331_s1 + $0x208] sm:$0xff]  ;;  %v757_v34 = vpack.c.bf16 %v201_v28, %v200_v27  ;;  %v252_v37 = vld [vmem:[%s1331_s1 + $0x210] sm:$0xff] }
  0x26   : > { %780 = vmatprep.subr.bf16.mxu1 %v779_v4  ;;  %v789_v35 = vpack.c.bf16 %v233_v31, %v232_v29  ;;  %v791_v36 = vpack.c.bf16 %v251_v33, %v250_v32  ;;  %v253_v38 = vld [vmem:[%s1331_s1 + $0x218] sm:$0xff]  ;;  %v176_v39 = vld [vmem:[%s1169_s7] sm:$0xff]  ;;  %v178_v40 = vld [vmem:[%s1169_s7 + $0x10] sm:$0xff] }
  0x27   : > { %750 = vmatpush3.bf16.msra.mxu0 %v749_v10  ;;  %v795_v41 = vpack.c.bf16 %v253_v38, %v252_v37  ;;  %v254_v42 = vld [vmem:[%s1331_s1 + $0x220] sm:$0xff]  ;;  %v255_v43 = vld [vmem:[%s1331_s1 + $0x228] sm:$0xff]  ;;  %v182_v44 = vld [vmem:[%s1169_s7 + $0x30] sm:$0xff] }
  0x28   : > { %752 = vmatprep.subr.bf16.mxu0 %v751_v14  ;;  %v184_v45 = vld [vmem:[%s1169_s7 + $0x40] sm:$0xff]  ;;  %v181_v46 = vld [vmem:[%s1169_s7 + $0x28] sm:$0xff]  ;;  %v799_v47 = vpack.c.bf16 %v255_v43, %v254_v42  ;;  %v183_v48 = vld [vmem:[%s1169_s7 + $0x38] sm:$0xff] }
  0x29   : > { %782 = vmatpush3.bf16.msra.mxu1 %v781_v13  ;;  %v256_v49 = vld [vmem:[%s1331_s1 + $0x230] sm:$0xff]  ;;  %v257_v50 = vld [vmem:[%s1331_s1 + $0x238] sm:$0xff]  ;;  %v180_v51 = vld [vmem:[%s1169_s7 + $0x20] sm:$0xff] }
  0x2a   : > { %784 = vmatprep.subr.bf16.mxu1 %v783_v18  ;;  %v803_v52 = vpack.c.bf16 %v257_v50, %v256_v49  ;;  %v258_v53 = vld [vmem:[%s1331_s1 + $0x240] sm:$0xff]  ;;  %v259_v54 = vld [vmem:[%s1331_s1 + $0x248] sm:$0xff]  ;;  %v260_v56 = vld [vmem:[%s1331_s1 + $0x250] sm:$0xff] }
  0x2b   : > { %754 = vmatpush3.bf16.msra.mxu0 %v753_v24  ;;  %v807_v55 = vpack.c.bf16 %v259_v54, %v258_v53  ;;  %v261_v57 = vld [vmem:[%s1331_s1 + $0x258] sm:$0xff]  ;;  %v262_v59 = vld [vmem:[%s1331_s1 + $0x260] sm:$0xff]  ;;  %v263_v60 = vld [vmem:[%s1331_s1 + $0x268] sm:$0xff] }
  0x2c   : > { %756 = vmatprep.subr.bf16.mxu0 %v755_v26  ;;  %v811_v58 = vpack.c.bf16 %v261_v57, %v260_v56  ;;  %v815_v61 = vpack.c.bf16 %v263_v60, %v262_v59  ;;  %v264_v62 = vld [vmem:[%s1331_s1 + $0x270] sm:$0xff]  ;;  %v265_v63 = vld [vmem:[%s1331_s1 + $0x278] sm:$0xff]  ;;  %v185_v1 = vld [vmem:[%s1169_s7 + $0x48] sm:$0xff]  ;;  %s165_s7 = sand.u32 1, %s927_s15  }
  0x2d   : > { %786 = vmatpush3.bf16.msra.mxu1 %v785_v25  ;;  %v819_v0 = vpack.c.bf16 %v265_v63, %v264_v62  ;;  %s587_s28 = sshll.u32 %s165_s7, 4  ;;  %s1289_s10 = scalar_lea.sflag [#allocation4], %s165_s7 }
  0x2e   : > { %788 = vmatprep.subr.bf16.mxu1 %v787_v30  ;;  %s167_s30 = scalar_lea.vmem [#allocation3], %s587_s28 }
  0x2f   : > { %758 = vmatpush3.bf16.msra.mxu0 %v757_v34  ;;  %s521_s4 = sshll.u32 %s167_s30, 4  ;;  %s1287_s4 = int_to_ptr.vmem [resolvable:$true] %s521_s4 }
  0x30   : > { %792 = vmatprep.subr.bf16.mxu0 %v791_v36  ;;  %s873_s11 = scalar_lea.vmem %s1287_s4, 256  ;;  %p880_p0 = scmp.lt.s32.totalorder %s1287_s4, %s878_s12 }
  0x31   : > { %790 = vmatpush3.bf16.msra.mxu1 %v789_v35  ;;  %p874_p11 = scmp.ne.s32.totalorder %s1287_s4, %s873_s11  ;;  %p881_p1 = scmp.lt.s32.totalorder %s879_s13, %s873_s11 }
  0x32   : > { %333 = vmatmul.mubr.f32.vlgmr.msra.gmra.mrb[0].mxu0 %v176_v39 }
  0x33   : > { %794 = vmatpush3.bf16.msra.mxu0 %v791_v36  ;;  %337 = vmatprep.mubr.f32.mxu0 %v182_v44  ;;  %p875_p12 = pnand %p874_p11, %p1001_p5  ;;  %p882_p2 = por %p881_p1, %p880_p0 }
  0x34   : > { %408 = vmatmul.mubr.f32.vlgmr.msra.gmra.mrb[0].mxu1 %v178_v40  ;;  %796 = vmatprep.subr.bf16.mxu0 %v795_v41 }
  0x35   : > { %412 = vmatprep.mubr.f32.mxu1 %v184_v45  ;;  %p876_p13 = pneg %p875_p12 }
  0x36   : > { %338 = vmatmul.mubr.f32.gmra.mrb[2].mxu0 %v181_v46 }
  0x37   : > { %798 = vmatpush3.bf16.msra.mxu0 %v795_v41  ;;  %724 = vmatprep.mubr.f32.mxu0 %v180_v51  ;;  %p883_p3 = pnand %p882_p2, %p876_p13 }
  0x38   : > { %413 = vmatmul.mubr.f32.gmra.mrb[2].mxu1 %v183_v48  ;;  %800 = vmatprep.subr.bf16.mxu0 %v799_v47 }
  0x3b   : > { %802 = vmatpush3.bf16.msra.mxu0 %v799_v47 }
  0x3c   : > { %804 = vmatprep.subr.bf16.mxu0 %v803_v52 }
  0x3f   : > { %806 = vmatpush3.bf16.msra.mxu0 %v803_v52 }
  0x40   : > { %808 = vmatprep.subr.bf16.mxu0 %v807_v55 }
  0x43   : > { %810 = vmatpush3.bf16.msra.mxu0 %v807_v55 }
  0x44   : > { %812 = vmatprep.subr.bf16.mxu0 %v811_v58 }
  0x47   : > { %814 = vmatpush3.bf16.msra.mxu0 %v811_v58 }
  0x48   : > { %816 = vmatprep.subr.bf16.mxu0 %v815_v61 }
  0x4b   : > { %818 = vmatpush3.bf16.msra.mxu0 %v815_v61 }
  0x4c   : > { %820 = vmatprep.subr.bf16.mxu0 %v819_v0 }
  0x4f   : > { %822 = vmatpush3.bf16.msra.mxu0 %v819_v0 }
  0x52   : > { %725 = vmatmul.mubr.f32.vlgmr.msra.gmra.mrb[4].mxu0 %v185_v1 }
 0x105   : > { %v630_v2 = vpop.f32.mrb[0].mxu0 }
 0x106   : > { %v631_v4 = vpop.f32.mrb[1].mxu0 }
 0x107   : > { %v668_v5 = vpop.f32.mrb[0].mxu1  ;;  %v632_v6 = vadd.f32 %v631_v4, %v630_v2 }
 0x108   : > { %v669_v7 = vpop.f32.mrb[1].mxu1 }
 0x109   : > { %v670_v8 = vadd.f32 %v669_v7, %v668_v5  ;;  %v335_v9 = vadd.f32 %v632_v6, %v267_v3  ;;  %v633_v10 = vpop.f32.mrb[2].mxu0 }
 0x10a   : > { %v634_v11 = vpop.f32.mrb[3].mxu0 }
 0x10b   : > { %v671_v12 = vpop.f32.mrb[2].mxu1  ;;  %v635_v13 = vadd.f32 %v634_v11, %v633_v10  ;;  %v410_v15 = vadd.f32 %v670_v8, %v335_v9 }
 0x10c   : > { %v672_v14 = vpop.f32.mrb[3].mxu1 }
 0x10d   : > { %v673_v16 = vadd.f32 %v672_v14, %v671_v12  ;;  %v340_v17 = vadd.f32 %v635_v13, %v267_v3 }
 0x10f   : > { %v415_v18 = vadd.f32 %v673_v16, %v340_v17 }
 0x125   : > { %v726_v19 = vpop.f32.mrb[4].mxu0 }
 0x126   : > { %v490_v20 = vadd.f32 %v726_v19, %v415_v18  ;;  %v484_v21 = vpop.f32.mrb[5].mxu0 }
 0x127   : > { %v485_v22 = vadd.f32 %v484_v21, %v410_v15 }
 0x128   : > { %v591_v23 = vmul.f32 -1.442695, %v490_v20 }
 0x129   : > { %v590_v24 = vmul.f32 -1.442695, %v485_v22 }
 0x12a   : > { %865 = vpow2.f32 %v591_v23 }
 0x12b   : > { %867 = vpow2.f32 %v590_v24 }
 0x134   : > { %v866_v25 = vpop.eup %865 }
 0x135   : > { %v868_v26 = vpop.eup %867  ;;  %v500_v27 = vadd.f32 1.0, %v866_v25 }
 0x136   : > { %v499_v28 = vadd.f32 1.0, %v868_v26 }
 0x137   : > { %869 = vrcp.f32 %v500_v27 }
 0x138   : > { %871 = vrcp.f32 %v499_v28 }
 0x141   : > { %v870_v29 = vpop.eup %869 }
 0x142   : > { %v872_v30 = vpop.eup %871  ;;  %506 = vst [vmem:[%s167_s30 + $0x8] sm:$0xff] %v870_v29 }
 0x143   : > { %505 = vst [vmem:[%s167_s30] sm:$0xff] %v872_v30 }
 0x144   : > { %886 = shalt.err (!%p883_p3)
}
 0x145   : > { %s887_s25 = scalar_lea.hbm %s1285_s9, 256  ;;  %s891_s21 = scalar_lea.hbm %s1333_s3, 512 }
 0x146   : > { %p888_p4 = scmp.ne.s32.totalorder %s1285_s9, %s887_s25  ;;  %p892_p9 = scmp.lt.u32.totalorder %s1285_s9, %s1333_s3 }
 0x147   : > { %p893_p10 = scmp.lt.u32.totalorder %s891_s21, %s887_s25  ;;  %p895_p12 = scmp.lt.u32.totalorder %s887_s25, %s1285_s9 }
 0x148   : > { %p889_p7 = pnand %p888_p4, %p1001_p5 }
 0x149   : > { %p894_p11 = por %p893_p10, %p892_p9 }
 0x14a   : > { %p890_p8 = pneg %p889_p7 }
 0x14b   : > { %p896_p13 = por %p895_p12, %p894_p11 }
 0x14d   : > { %p897_p0 = pnand %p896_p13, %p890_p8 }
 0x14f   : > { %900 = shalt.err (!%p897_p0)
}
 0x150   : > { %s938_s27 = smov 128   ;;  %s939_s7 = smov 8  }
 0x151   : > { %824 = dma.vmem_to_hbm [thread:$0]  (%p1001_p5), %s1287_s4, 256, %s1285_s9, %s1289_s10, %s938_s27, %s938_s27, %s939_s7  }
 0x152 PF: > { %p830_p1 = scmp.ge.s32.totalorder %s935_s17, 2  ;;  %s536_s28 = sand.u32 1, %s923_s14  }
 0x153   : > { %s537_s29 = scalar_lea.sflag [#allocation4], %s536_s28 }
 0x154   : > { %p827_p2 = pnand %p830_p1, %p1005_p6 }
 0x156   : > { %918 = dma.done.wait (!%p827_p2), %s537_s29, 256  }
 0x157   : > { %920 = vsyncadd (!%p827_p2), %s537_s29, 4294967040  ;;  %p14_p3 = scmp.ge.s32.totalorder %s988_s19, 4   ;;  %s1337_s14 = smov %s927_s15 }
 0x158   : > { %s1338_s15 = smov %s931_s16  ;;  %s1339_s16 = smov %s999_s22 }
 0x159   : > { %s1340_s17 = smov %s988_s19  ;;  %16 = sbr.rel (!%p14_p3) target bundleno = 5 (0x5), region = 67 }
 0x160   :  { %542 = vsyncpa [#allocation4], 1 }
 0x161   :  { %544 = vsyncpa [#allocation4 + $0x1], 1 }

</bundles_post_ra>
